<compile_context>
chip_gen: v6e
topology: v6e:2x2x1
jax: 0.10.0
libtpu: 0.0.40
codegen_flags: <defaults>
</compile_context>

<pallas_src>
import jax
import jax.numpy as jnp
from jax.experimental import pallas as pl
from jax.experimental.pallas import tpu as pltpu

# ----------------------------- model config ----------------------------------
BATCH = 2
SEQ = 8
DIM = 32
N_HEADS = 4
N_KV_HEADS = 2
N_REP = N_HEADS // N_KV_HEADS
HEAD_DIM = DIM // N_HEADS                 # 8
FFN_DIM = 32                              # model_args.ffn_dim
MULTIPLE_OF = 16
_hidden = int(2 * (4 * FFN_DIM) / 3)
HIDDEN_DIM = MULTIPLE_OF * ((_hidden + MULTIPLE_OF - 1) // MULTIPLE_OF)   # 96
NORM_EPS = 1e-6
ROPE_THETA = 10000.0

TOKENS = BATCH * SEQ                      # 16 flattened (batch*seq) rows
Q_W = N_HEADS * HEAD_DIM                  # 32
KV_W = N_KV_HEADS * HEAD_DIM              # 16
QK_W = Q_W + KV_W                         # 48
NEG_BIG = -1e30                           # finite mask value (no NaN risk)

# bitwise mask tricks in the kernel assume power-of-two SEQ / TOKENS
assert SEQ & (SEQ - 1) == 0 and TOKENS & (TOKENS - 1) == 0


# ------------------------------ pallas kernel --------------------------------
def titan_decoder_kernel(x_ref, cs_ref, wbig_ref, wo_ref, w13_ref, w2_ref, out_ref):
    f32, bf16 = jnp.float32, jnp.bfloat16
    x = x_ref[...]                                            # (T, D) f32

    def rmsnorm(v):                                           # gains folded into weights
        return v * jax.lax.rsqrt(jnp.mean(v * v, axis=-1, keepdims=True) + NORM_EPS)

    # Causal + same-batch additive bias, generated in-kernel (no (T,T) HBM input).
    # Rows cover the N_REP query heads stacked along sublanes -> (N_REP*T, T).
    row = jax.lax.broadcasted_iota(jnp.int32, (N_REP * TOKENS, TOKENS), 0) & (TOKENS - 1)
    col = jax.lax.broadcasted_iota(jnp.int32, (N_REP * TOKENS, TOKENS), 1)
    allowed = (row >= col) & ((row ^ col) < SEQ)              # causal AND same-batch (pow2 SEQ)
    bias = jnp.where(allowed, 0.0, NEG_BIG).astype(f32)       # (N_REP*T, T)

    # ---------------- attention branch ----------------
    xn = rmsnorm(x).astype(bf16)
    # One fused matmul: [q|k] (48) | v (16) | rotated [q|k] (48)  — rotation + softmax
    # scale + norm gain are all folded into the weight on the host.
    big = jnp.dot(xn, wbig_ref[...], preferred_element_type=f32)        # (T, 112) f32
    qk = big[:, :QK_W]
    v = big[:, QK_W:QK_W + KV_W]
    qk_rot = big[:, QK_W + KV_W:]
    qk = qk * cs_ref[:, :QK_W] + qk_rot * cs_ref[:, QK_W:]              # RoPE
    q = qk[:, :Q_W].astype(bf16)
    k = qk[:, Q_W:].astype(bf16)
    vb = v.astype(bf16)
    wo = wo_ref[...]                                                    # (32, 32) bf16

    attn_proj = jnp.zeros((TOKENS, DIM), f32)
    for kvh in range(N_KV_HEADS):
        kh = k[:, kvh * HEAD_DIM:(kvh + 1) * HEAD_DIM]                  # (T, hd)
        vh = vb[:, kvh * HEAD_DIM:(kvh + 1) * HEAD_DIM]                 # (T, hd)
        h0 = kvh * N_REP
        # Stack the N_REP query heads sharing this kv head along sublanes.
        q2 = jnp.concatenate(
            [q[:, (h0 + r) * HEAD_DIM:(h0 + r + 1) * HEAD_DIM] for r in range(N_REP)],
            axis=0)                                                     # (N_REP*T, hd)
        s = jax.lax.dot_general(q2, kh, (((1,), (1,)), ((), ())),
                                preferred_element_type=f32) + bias      # (N_REP*T, T)
        p = jnp.exp(s - jnp.max(s, axis=-1, keepdims=True))
        p = p / jnp.sum(p, axis=-1, keepdims=True)                      # exact softmax
        pv = jnp.dot(p.astype(bf16), vh, preferred_element_type=f32)    # (N_REP*T, hd)
        # Project each head's PV block through its Wo row-block and accumulate:
        # avoids lane-concatenation of narrow head outputs entirely.
        for r in range(N_REP):
            h = h0 + r
            attn_proj = attn_proj + jnp.dot(
                pv[r * TOKENS:(r + 1) * TOKENS].astype(bf16),
                wo[h * HEAD_DIM:(h + 1) * HEAD_DIM, :],
                preferred_element_type=f32)
    h_res = x + attn_proj

    # ---------------- SwiGLU feed-forward branch ----------------
    hn = rmsnorm(h_res).astype(bf16)
    ab = jnp.dot(hn, w13_ref[...], preferred_element_type=f32)          # (T, 192)
    a = ab[:, :HIDDEN_DIM]
    b = ab[:, HIDDEN_DIM:]
    sw = (a * jax.nn.sigmoid(a) * b).astype(bf16)                       # silu in f32
    ff = jnp.dot(sw, w2_ref[...], preferred_element_type=f32)           # (T, D)

    # Full (B*S, D) slab written in one step.
    out_ref[...] = h_res + ff


# ------------------------------- wrapper --------------------------------------
@jax.jit
def titan_decoder(x, cs, packed):
    B, S, D = x.shape
    T = B * S
    vmem = pl.BlockSpec(memory_space=pltpu.MemorySpace.VMEM)   # whole array in VMEM
    out2d = pl.pallas_call(
        titan_decoder_kernel,
        out_shape=jax.ShapeDtypeStruct((T, D), jnp.float32),
        in_specs=[vmem] * 6,
        out_specs=vmem,
    )(x.reshape(T, D), cs,
      packed["wbig"], packed["woT"], packed["w13"], packed["w2T"])
    return out2d.reshape(B, S, D)


# ------------------------- pure-JAX reference ---------------------------------
def reference(x, cosf, sinf, params):
    def rmsnorm(v, g):
        ms = jnp.mean(v * v, axis=-1, keepdims=True)
        return v * jax.lax.rsqrt(ms + NORM_EPS) * g

    xn = rmsnorm(x, params["g_att"])
    q = xn @ params["wqT"]
    k = xn @ params["wkT"]
    v = xn @ params["wvT"]
    B, S, _ = x.shape
    q = q.reshape(B, S, N_HEADS, HEAD_DIM)
    k = k.reshape(B, S, N_KV_HEADS, HEAD_DIM)
    v = v.reshape(B, S, N_KV_HEADS, HEAD_DIM)

    def rope(t):
        te = t[..., 0::2]
        to = t[..., 1::2]
        c = cosf[None, :, None, 0::2]
        s = sinf[None, :, None, 0::2]
        oe = te * c - to * s
        oo = to * c + te * s
        return jnp.stack([oe, oo], axis=-1).reshape(t.shape)

    q, k = rope(q), rope(k)
    k = jnp.repeat(k, N_REP, axis=2)
    v = jnp.repeat(v, N_REP, axis=2)
    scale = 1.0 / jnp.sqrt(jnp.float32(HEAD_DIM))
    scores = jnp.einsum("bqhd,bkhd->bhqk", q, k) * scale
    mask = jnp.tril(jnp.ones((S, S), bool))
    scores = jnp.where(mask[None, None], scores, -jnp.inf)
    p = jax.nn.softmax(scores, axis=-1)
    o = jnp.einsum("bhqk,bkhd->bqhd", p, v).reshape(B, S, -1)
    h = x + o @ params["woT"]

    hn = rmsnorm(h, params["g_ffn"])
    a = hn @ params["w1T"]
    b = hn @ params["w3T"]
    return h + (a * jax.nn.sigmoid(a) * b) @ params["w2T"]


# --------------------------------- main ---------------------------------------
if __name__ == "__main__":
    key = jax.random.PRNGKey(0)
    keys = jax.random.split(key, 10)

    def trunc(k, shape, std):
        return jax.random.truncated_normal(k, -2.0, 2.0, shape, jnp.float32) * std

    init_std = 0.02 / (2 * (0 + 1)) ** 0.5   # layer_id = 0, depth_init=True

    params = {
        # Linear weights pre-transposed to (in, out)
        "wqT": trunc(keys[0], (DIM, Q_W), 0.02),
        "wkT": trunc(keys[1], (DIM, KV_W), 0.02),
        "wvT": trunc(keys[2], (DIM, KV_W), 0.02),
        "woT": trunc(keys[3], (Q_W, DIM), init_std),
        "w1T": trunc(keys[4], (DIM, HIDDEN_DIM), 0.02),
        "w2T": trunc(keys[5], (HIDDEN_DIM, DIM), init_std),
        "w3T": trunc(keys[6], (DIM, HIDDEN_DIM), init_std),
        # RMSNorm gains (reset_parameters -> ones)
        "g_att": jnp.ones((DIM,), jnp.float32),
        "g_ffn": jnp.ones((DIM,), jnp.float32),
    }

    # RoPE tables: freqs_cis (S, head_dim//2) expanded interleaved to (S, head_dim)
    inv_freq = 1.0 / (ROPE_THETA ** (jnp.arange(0, HEAD_DIM, 2, dtype=jnp.float32) / HEAD_DIM))
    angles = jnp.outer(jnp.arange(SEQ, dtype=jnp.float32), inv_freq)     # (S, hd/2)
    cosf = jnp.repeat(jnp.cos(angles), 2, axis=-1)                       # (S, hd)
    sinf = jnp.repeat(jnp.sin(angles), 2, axis=-1)                       # (S, hd)

    # Per-head pair-rotation: (x @ rot8)[2j] = -x[2j+1], (x @ rot8)[2j+1] = x[2j]
    rot8 = jnp.zeros((HEAD_DIM, HEAD_DIM), jnp.float32)
    idx = jnp.arange(0, HEAD_DIM, 2)
    rot8 = rot8.at[idx + 1, idx].set(-1.0)
    rot8 = rot8.at[idx, idx + 1].set(1.0)
    n_blk = N_HEADS + N_KV_HEADS                                          # 6
    R = jnp.kron(jnp.eye(n_blk, dtype=jnp.float32), rot8)                 # (48, 48) block-diag

    # ---- one-time host-side packing (layout plumbing, done once like weight loading) ----
    scale = 1.0 / float(HEAD_DIM) ** 0.5
    # softmax scale folded into Wq columns; RoPE rotation folded into extra weight columns;
    # attention-norm gain folded into the rows; everything cast to bf16 for the MXU.
    wqk = jnp.concatenate([params["wqT"] * scale, params["wkT"]], axis=1)        # (32, 48)
    wbig = jnp.concatenate([wqk, params["wvT"], wqk @ R], axis=1)                # (32, 112)
    wbig = params["g_att"][:, None] * wbig
    w13 = params["g_ffn"][:, None] * jnp.concatenate([params["w1T"], params["w3T"]], axis=1)  # (32,192)

    packed = {
        "wbig": wbig.astype(jnp.bfloat16),                    # (32, 112)
        "woT": params["woT"].astype(jnp.bfloat16),            # (32, 32)
        "w13": w13.astype(jnp.bfloat16),                      # (32, 192)
        "w2T": params["w2T"].astype(jnp.bfloat16),            # (96, 32)
    }

    # cos/sin tables for the fused [q|k] slab, packed into ONE (T, 96) f32 constant
    cos_qk = jnp.tile(jnp.tile(cosf, (1, n_blk)), (BATCH, 1))             # (T, 48)
    sin_qk = jnp.tile(jnp.tile(sinf, (1, n_blk)), (BATCH, 1))             # (T, 48)
    cs = jnp.concatenate([cos_qk, sin_qk], axis=1)                        # (T, 96)

    x = jax.random.normal(keys[7], (BATCH, SEQ, DIM), jnp.float32)

    out = jax.block_until_ready(titan_decoder(x, cs, packed))

    ref = reference(x, cosf, sinf, params)
    assert out.shape == (BATCH, SEQ, DIM)
    # tolerance accounts for bf16 matmul operands (f32 accumulation, f32 softmax/norms)
    assert jnp.allclose(out, ref, rtol=2e-3, atol=2e-3), "mismatch vs JAX reference"

    print("KERNEL_OK")
</pallas_src>

<mosaic_0001>
module attributes {stable_mosaic.version = 11 : i64} {
  func.func @titan_decoder_kernel(%arg0: memref<16x32xf32, #tpu.memory_space<vmem>>, %arg1: memref<16x96xf32, #tpu.memory_space<vmem>>, %arg2: memref<32x112xbf16, #tpu.memory_space<vmem>>, %arg3: memref<32x32xbf16, #tpu.memory_space<vmem>>, %arg4: memref<32x192xbf16, #tpu.memory_space<vmem>>, %arg5: memref<96x32xbf16, #tpu.memory_space<vmem>>, %arg6: memref<16x32xf32, #tpu.memory_space<vmem>>) attributes {dimension_semantics = [], scalar_prefetch = 0 : i64, scratch_operands = 0 : i64, tpu.core_type = #tpu.core_type<tc>} {
    %c0 = arith.constant 0 : index
    %c0_0 = arith.constant 0 : index
    %0 = vector.load %arg0[%c0, %c0_0] : memref<16x32xf32, #tpu.memory_space<vmem>>, vector<16x32xf32>
    %1 = tpu.iota {dimensions = array<i32: 0>} : vector<32x16xi32>
    %c15_i32 = arith.constant 15 : i32
    %2 = vector.broadcast %c15_i32 : i32 to vector<32x16xi32>
    %3 = arith.andi %1, %2 : vector<32x16xi32>
    %4 = tpu.iota {dimensions = array<i32: 1>} : vector<32x16xi32>
    %5 = arith.cmpi sge, %3, %4 : vector<32x16xi32>
    %6 = arith.xori %3, %4 : vector<32x16xi32>
    %c8_i32 = arith.constant 8 : i32
    %7 = vector.broadcast %c8_i32 : i32 to vector<32x16xi32>
    %8 = arith.cmpi slt, %6, %7 : vector<32x16xi32>
    %9 = arith.andi %5, %8 : vector<32x16xi1>
    %cst = arith.constant 0.000000e+00 : f32
    %cst_1 = arith.constant -1.000000e+30 : f32
    %10 = vector.broadcast %cst : f32 to vector<32x16xf32>
    %11 = vector.broadcast %cst_1 : f32 to vector<32x16xf32>
    %12 = arith.select %9, %10, %11 : vector<32x16xi1>, vector<32x16xf32>
    %13 = arith.mulf %0, %0 : vector<16x32xf32>
    %cst_2 = arith.constant dense<0.000000e+00> : vector<16xf32>
    %14 = vector.multi_reduction <add>, %13, %cst_2 [1] : vector<16x32xf32> to vector<16xf32>
    %15 = vector.shape_cast %14 : vector<16xf32> to vector<16x1xf32>
    %cst_3 = arith.constant 3.200000e+01 : f32
    %16 = vector.broadcast %cst_3 : f32 to vector<16x1xf32>
    %17 = arith.divf %15, %16 : vector<16x1xf32>
    %cst_4 = arith.constant 9.99999997E-7 : f32
    %18 = vector.broadcast %cst_4 : f32 to vector<16x1xf32>
    %19 = arith.addf %17, %18 : vector<16x1xf32>
    %20 = math.rsqrt %19 : vector<16x1xf32>
    %21 = vector.broadcast %20 : vector<16x1xf32> to vector<16x32xf32>
    %22 = arith.mulf %0, %21 : vector<16x32xf32>
    %23 = arith.truncf %22 : vector<16x32xf32> to vector<16x32xbf16>
    %c0_5 = arith.constant 0 : index
    %c0_6 = arith.constant 0 : index
    %24 = vector.load %arg2[%c0_5, %c0_6] : memref<32x112xbf16, #tpu.memory_space<vmem>>, vector<32x112xbf16>
    %cst_7 = arith.constant dense<0.000000e+00> : vector<16x112xf32>
    %25 = tpu.matmul %23, %24, %cst_7 {dimension_numbers = #tpu.dot_dimension_numbers<[1], [0], [0], [1], [0, 0, 1, 1], [], []>} : vector<16x32xbf16>, vector<32x112xbf16>, vector<16x112xf32> -> vector<16x112xf32>
    %26 = vector.extract_strided_slice %25 {offsets = [0, 0], sizes = [16, 48], strides = [1, 1]} : vector<16x112xf32> to vector<16x48xf32>
    %27 = vector.extract_strided_slice %25 {offsets = [0, 48], sizes = [16, 16], strides = [1, 1]} : vector<16x112xf32> to vector<16x16xf32>
    %28 = vector.extract_strided_slice %25 {offsets = [0, 64], sizes = [16, 48], strides = [1, 1]} : vector<16x112xf32> to vector<16x48xf32>
    %c0_8 = arith.constant 0 : index
    %c0_9 = arith.constant 0 : index
    %29 = vector.load %arg1[%c0_8, %c0_9] : memref<16x96xf32, #tpu.memory_space<vmem>>, vector<16x48xf32>
    %30 = arith.mulf %26, %29 : vector<16x48xf32>
    %c0_10 = arith.constant 0 : index
    %c48 = arith.constant 48 : index
    %31 = vector.load %arg1[%c0_10, %c48] : memref<16x96xf32, #tpu.memory_space<vmem>>, vector<16x48xf32>
    %32 = arith.mulf %28, %31 : vector<16x48xf32>
    %33 = arith.addf %30, %32 : vector<16x48xf32>
    %34 = vector.extract_strided_slice %33 {offsets = [0, 0], sizes = [16, 32], strides = [1, 1]} : vector<16x48xf32> to vector<16x32xf32>
    %35 = arith.truncf %34 : vector<16x32xf32> to vector<16x32xbf16>
    %36 = vector.extract_strided_slice %33 {offsets = [0, 32], sizes = [16, 16], strides = [1, 1]} : vector<16x48xf32> to vector<16x16xf32>
    %37 = arith.truncf %36 : vector<16x16xf32> to vector<16x16xbf16>
    %38 = arith.truncf %27 : vector<16x16xf32> to vector<16x16xbf16>
    %c0_11 = arith.constant 0 : index
    %c0_12 = arith.constant 0 : index
    %39 = vector.load %arg3[%c0_11, %c0_12] : memref<32x32xbf16, #tpu.memory_space<vmem>>, vector<32x32xbf16>
    %cst_13 = arith.constant 0.000000e+00 : f32
    %40 = vector.broadcast %cst_13 : f32 to vector<16x32xf32>
    %41 = vector.extract_strided_slice %37 {offsets = [0, 0], sizes = [16, 8], strides = [1, 1]} : vector<16x16xbf16> to vector<16x8xbf16>
    %42 = vector.extract_strided_slice %38 {offsets = [0, 0], sizes = [16, 8], strides = [1, 1]} : vector<16x16xbf16> to vector<16x8xbf16>
    %43 = vector.extract_strided_slice %35 {offsets = [0, 0], sizes = [16, 8], strides = [1, 1]} : vector<16x32xbf16> to vector<16x8xbf16>
    %44 = vector.extract_strided_slice %35 {offsets = [0, 8], sizes = [16, 8], strides = [1, 1]} : vector<16x32xbf16> to vector<16x8xbf16>
    %45 = tpu.concatenate %43, %44 in 0 : vector<16x8xbf16>, vector<16x8xbf16> -> vector<32x8xbf16>
    %cst_14 = arith.constant dense<0.000000e+00> : vector<32x16xf32>
    %46 = tpu.matmul %45, %41, %cst_14 {dimension_numbers = #tpu.dot_dimension_numbers<[1], [1], [0], [0], [0, 0, 1, 0], [], []>} : vector<32x8xbf16>, vector<16x8xbf16>, vector<32x16xf32> -> vector<32x16xf32>
    %47 = arith.addf %46, %12 : vector<32x16xf32>
    %cst_15 = arith.constant dense<0xFF800000> : vector<32xf32>
    %48 = vector.multi_reduction <maximumf>, %47, %cst_15 [1] : vector<32x16xf32> to vector<32xf32>
    %49 = vector.shape_cast %48 : vector<32xf32> to vector<32x1xf32>
    %50 = vector.broadcast %49 : vector<32x1xf32> to vector<32x16xf32>
    %51 = arith.subf %47, %50 : vector<32x16xf32>
    %52 = math.exp %51 : vector<32x16xf32>
    %cst_16 = arith.constant dense<0.000000e+00> : vector<32xf32>
    %53 = vector.multi_reduction <add>, %52, %cst_16 [1] : vector<32x16xf32> to vector<32xf32>
    %54 = vector.shape_cast %53 : vector<32xf32> to vector<32x1xf32>
    %55 = vector.broadcast %54 : vector<32x1xf32> to vector<32x16xf32>
    %56 = arith.divf %52, %55 : vector<32x16xf32>
    %57 = arith.truncf %56 : vector<32x16xf32> to vector<32x16xbf16>
    %cst_17 = arith.constant dense<0.000000e+00> : vector<32x8xf32>
    %58 = tpu.matmul %57, %42, %cst_17 {dimension_numbers = #tpu.dot_dimension_numbers<[1], [0], [0], [1], [0, 0, 1, 1], [], []>} : vector<32x16xbf16>, vector<16x8xbf16>, vector<32x8xf32> -> vector<32x8xf32>
    %59 = vector.extract_strided_slice %58 {offsets = [0, 0], sizes = [16, 8], strides = [1, 1]} : vector<32x8xf32> to vector<16x8xf32>
    %60 = arith.truncf %59 : vector<16x8xf32> to vector<16x8xbf16>
    %61 = vector.extract_strided_slice %39 {offsets = [0, 0], sizes = [8, 32], strides = [1, 1]} : vector<32x32xbf16> to vector<8x32xbf16>
    %cst_18 = arith.constant dense<0.000000e+00> : vector<16x32xf32>
    %62 = tpu.matmul %60, %61, %cst_18 {dimension_numbers = #tpu.dot_dimension_numbers<[1], [0], [0], [1], [0, 0, 1, 1], [], []>} : vector<16x8xbf16>, vector<8x32xbf16>, vector<16x32xf32> -> vector<16x32xf32>
    %63 = arith.addf %40, %62 : vector<16x32xf32>
    %64 = vector.extract_strided_slice %58 {offsets = [16, 0], sizes = [16, 8], strides = [1, 1]} : vector<32x8xf32> to vector<16x8xf32>
    %65 = arith.truncf %64 : vector<16x8xf32> to vector<16x8xbf16>
    %66 = vector.extract_strided_slice %39 {offsets = [8, 0], sizes = [8, 32], strides = [1, 1]} : vector<32x32xbf16> to vector<8x32xbf16>
    %cst_19 = arith.constant dense<0.000000e+00> : vector<16x32xf32>
    %67 = tpu.matmul %65, %66, %cst_19 {dimension_numbers = #tpu.dot_dimension_numbers<[1], [0], [0], [1], [0, 0, 1, 1], [], []>} : vector<16x8xbf16>, vector<8x32xbf16>, vector<16x32xf32> -> vector<16x32xf32>
    %68 = arith.addf %63, %67 : vector<16x32xf32>
    %69 = vector.extract_strided_slice %37 {offsets = [0, 8], sizes = [16, 8], strides = [1, 1]} : vector<16x16xbf16> to vector<16x8xbf16>
    %70 = vector.extract_strided_slice %38 {offsets = [0, 8], sizes = [16, 8], strides = [1, 1]} : vector<16x16xbf16> to vector<16x8xbf16>
    %71 = vector.extract_strided_slice %35 {offsets = [0, 16], sizes = [16, 8], strides = [1, 1]} : vector<16x32xbf16> to vector<16x8xbf16>
    %72 = vector.extract_strided_slice %35 {offsets = [0, 24], sizes = [16, 8], strides = [1, 1]} : vector<16x32xbf16> to vector<16x8xbf16>
    %73 = tpu.concatenate %71, %72 in 0 : vector<16x8xbf16>, vector<16x8xbf16> -> vector<32x8xbf16>
    %cst_20 = arith.constant dense<0.000000e+00> : vector<32x16xf32>
    %74 = tpu.matmul %73, %69, %cst_20 {dimension_numbers = #tpu.dot_dimension_numbers<[1], [1], [0], [0], [0, 0, 1, 0], [], []>} : vector<32x8xbf16>, vector<16x8xbf16>, vector<32x16xf32> -> vector<32x16xf32>
    %75 = arith.addf %74, %12 : vector<32x16xf32>
    %cst_21 = arith.constant dense<0xFF800000> : vector<32xf32>
    %76 = vector.multi_reduction <maximumf>, %75, %cst_21 [1] : vector<32x16xf32> to vector<32xf32>
    %77 = vector.shape_cast %76 : vector<32xf32> to vector<32x1xf32>
    %78 = vector.broadcast %77 : vector<32x1xf32> to vector<32x16xf32>
    %79 = arith.subf %75, %78 : vector<32x16xf32>
    %80 = math.exp %79 : vector<32x16xf32>
    %cst_22 = arith.constant dense<0.000000e+00> : vector<32xf32>
    %81 = vector.multi_reduction <add>, %80, %cst_22 [1] : vector<32x16xf32> to vector<32xf32>
    %82 = vector.shape_cast %81 : vector<32xf32> to vector<32x1xf32>
    %83 = vector.broadcast %82 : vector<32x1xf32> to vector<32x16xf32>
    %84 = arith.divf %80, %83 : vector<32x16xf32>
    %85 = arith.truncf %84 : vector<32x16xf32> to vector<32x16xbf16>
    %cst_23 = arith.constant dense<0.000000e+00> : vector<32x8xf32>
    %86 = tpu.matmul %85, %70, %cst_23 {dimension_numbers = #tpu.dot_dimension_numbers<[1], [0], [0], [1], [0, 0, 1, 1], [], []>} : vector<32x16xbf16>, vector<16x8xbf16>, vector<32x8xf32> -> vector<32x8xf32>
    %87 = vector.extract_strided_slice %86 {offsets = [0, 0], sizes = [16, 8], strides = [1, 1]} : vector<32x8xf32> to vector<16x8xf32>
    %88 = arith.truncf %87 : vector<16x8xf32> to vector<16x8xbf16>
    %89 = vector.extract_strided_slice %39 {offsets = [16, 0], sizes = [8, 32], strides = [1, 1]} : vector<32x32xbf16> to vector<8x32xbf16>
    %cst_24 = arith.constant dense<0.000000e+00> : vector<16x32xf32>
    %90 = tpu.matmul %88, %89, %cst_24 {dimension_numbers = #tpu.dot_dimension_numbers<[1], [0], [0], [1], [0, 0, 1, 1], [], []>} : vector<16x8xbf16>, vector<8x32xbf16>, vector<16x32xf32> -> vector<16x32xf32>
    %91 = arith.addf %68, %90 : vector<16x32xf32>
    %92 = vector.extract_strided_slice %86 {offsets = [16, 0], sizes = [16, 8], strides = [1, 1]} : vector<32x8xf32> to vector<16x8xf32>
    %93 = arith.truncf %92 : vector<16x8xf32> to vector<16x8xbf16>
    %94 = vector.extract_strided_slice %39 {offsets = [24, 0], sizes = [8, 32], strides = [1, 1]} : vector<32x32xbf16> to vector<8x32xbf16>
    %cst_25 = arith.constant dense<0.000000e+00> : vector<16x32xf32>
    %95 = tpu.matmul %93, %94, %cst_25 {dimension_numbers = #tpu.dot_dimension_numbers<[1], [0], [0], [1], [0, 0, 1, 1], [], []>} : vector<16x8xbf16>, vector<8x32xbf16>, vector<16x32xf32> -> vector<16x32xf32>
    %96 = arith.addf %91, %95 : vector<16x32xf32>
    %97 = arith.addf %0, %96 : vector<16x32xf32>
    %98 = arith.mulf %97, %97 : vector<16x32xf32>
    %cst_26 = arith.constant dense<0.000000e+00> : vector<16xf32>
    %99 = vector.multi_reduction <add>, %98, %cst_26 [1] : vector<16x32xf32> to vector<16xf32>
    %100 = vector.shape_cast %99 : vector<16xf32> to vector<16x1xf32>
    %cst_27 = arith.constant 3.200000e+01 : f32
    %101 = vector.broadcast %cst_27 : f32 to vector<16x1xf32>
    %102 = arith.divf %100, %101 : vector<16x1xf32>
    %cst_28 = arith.constant 9.99999997E-7 : f32
    %103 = vector.broadcast %cst_28 : f32 to vector<16x1xf32>
    %104 = arith.addf %102, %103 : vector<16x1xf32>
    %105 = math.rsqrt %104 : vector<16x1xf32>
    %106 = vector.broadcast %105 : vector<16x1xf32> to vector<16x32xf32>
    %107 = arith.mulf %97, %106 : vector<16x32xf32>
    %108 = arith.truncf %107 : vector<16x32xf32> to vector<16x32xbf16>
    %c0_29 = arith.constant 0 : index
    %c0_30 = arith.constant 0 : index
    %109 = vector.load %arg4[%c0_29, %c0_30] : memref<32x192xbf16, #tpu.memory_space<vmem>>, vector<32x192xbf16>
    %cst_31 = arith.constant dense<0.000000e+00> : vector<16x192xf32>
    %110 = tpu.matmul %108, %109, %cst_31 {dimension_numbers = #tpu.dot_dimension_numbers<[1], [0], [0], [1], [0, 0, 1, 1], [], []>} : vector<16x32xbf16>, vector<32x192xbf16>, vector<16x192xf32> -> vector<16x192xf32>
    %111 = vector.extract_strided_slice %110 {offsets = [0, 0], sizes = [16, 96], strides = [1, 1]} : vector<16x192xf32> to vector<16x96xf32>
    %112 = vector.extract_strided_slice %110 {offsets = [0, 96], sizes = [16, 96], strides = [1, 1]} : vector<16x192xf32> to vector<16x96xf32>
    %113 = arith.negf %111 : vector<16x96xf32>
    %114 = math.exp %113 : vector<16x96xf32>
    %cst_32 = arith.constant 1.000000e+00 : f32
    %115 = vector.broadcast %cst_32 : f32 to vector<16x96xf32>
    %116 = arith.addf %115, %114 : vector<16x96xf32>
    %117 = arith.divf %115, %116 : vector<16x96xf32>
    %118 = arith.mulf %111, %117 : vector<16x96xf32>
    %119 = arith.mulf %118, %112 : vector<16x96xf32>
    %120 = arith.truncf %119 : vector<16x96xf32> to vector<16x96xbf16>
    %c0_33 = arith.constant 0 : index
    %c0_34 = arith.constant 0 : index
    %121 = vector.load %arg5[%c0_33, %c0_34] : memref<96x32xbf16, #tpu.memory_space<vmem>>, vector<96x32xbf16>
    %cst_35 = arith.constant dense<0.000000e+00> : vector<16x32xf32>
    %122 = tpu.matmul %120, %121, %cst_35 {dimension_numbers = #tpu.dot_dimension_numbers<[1], [0], [0], [1], [0, 0, 1, 1], [], []>} : vector<16x96xbf16>, vector<96x32xbf16>, vector<16x32xf32> -> vector<16x32xf32>
    %123 = arith.addf %97, %122 : vector<16x32xf32>
    %c0_36 = arith.constant 0 : index
    %c0_37 = arith.constant 0 : index
    %124 = vector.load %arg6[%c0_36, %c0_37] : memref<16x32xf32, #tpu.memory_space<vmem>>, vector<16x32xf32>
    tpu.vector_store %arg6[%c0_36, %c0_37], %123 {strides = array<i32>} : memref<16x32xf32, #tpu.memory_space<vmem>>, vector<16x32xf32>,
    return
  }
}

</mosaic_0001>

<bundles_post_ra>
// kernel: titan_decoder.1
= control target key start
LH: loop header
LB: loop body
LE: loop exit
PB: predicated region body
PF: predicated region fallthrough
CT: control target
= control target key end

     0   :  { %11 = vsyncpa [#allocation3], 0  ;;  %s1489_s0 = inlined_call_operand.vmem [shape: f32[16,32], index: 0, kind: input, shape index: {}]   ;;  %s1490_s1 = inlined_call_operand.vmem [shape: f32[16,96], index: 1, kind: input, shape index: {}]   ;;  %s1491_s2 = inlined_call_operand.hbm [shape: bf16[32,112], index: 2, kind: input, shape index: {}]   ;;  %s1492_s3 = inlined_call_operand.hbm [shape: bf16[32,32], index: 3, kind: input, shape index: {}]   ;;  %s1493_s4 = inlined_call_operand.vmem [shape: bf16[32,192], index: 4, kind: input, shape index: {}]   ;;  %s1494_s5 = inlined_call_operand.vmem [shape: bf16[96,32], index: 5, kind: input, shape index: {}]   ;;  %s1495_s6 = inlined_call_operand.hbm [shape: f32[16,32], index: 6, kind: output, shape index: {}]  }
   0x1   :  { %12 = vsyncpa [#allocation6], 0 }
   0x2   :  { %13 = vsyncpa [#allocation4], 0  ;;  %s1247_s21 = smov [#allocation2]  }
   0x3   :  { %s23_s22 = sshll.u32 %s1247_s21, 4  ;;  %s24_s22 = int_to_ptr.vmem [resolvable:$true] %s23_s22 }
   0x4   :  { %s1189_s23 = scalar_lea.vmem %s24_s22, 256  ;;  %p1194_p1 = scmp.lt.s32.totalorder %s24_s22, %s24_s22 }
   0x5   :  { %p1190_p0 = scmp.ne.s32.totalorder %s24_s22, %s1189_s23  ;;  %p1195_p2 = scmp.lt.s32.totalorder %s1189_s23, %s1189_s23 }
   0x7   :  { %p1196_p3 = por %p1195_p2, %p1194_p1 }
   0x9   :  { %p1197_p4 = pnand %p1196_p3, %p1190_p0 }
   0xb   :  { %1200 = shalt.err (!%p1197_p4)
}
   0xc   :  { %s1248_s24 = smov 64   ;;  %s1249_s25 = smov 4  }
   0xd   :  { %29 = dma.hbm_to_vmem [thread:$0]  %s1491_s2, 256, %s24_s22, [#allocation3], %s1248_s24, %s1248_s24, %s1249_s25  }
   0xe   :  { %s1250_s28 = smov [#allocation5]  }
   0xf   :  { %s35_s29 = sshll.u32 %s1250_s28, 4  ;;  %s36_s29 = int_to_ptr.vmem [resolvable:$true] %s35_s29 }
  0x10   :  { %s1209_s30 = scalar_lea.vmem %s36_s29, 256  ;;  %p1214_p6 = scmp.lt.s32.totalorder %s36_s29, %s36_s29 }
  0x11   :  { %p1210_p5 = scmp.ne.s32.totalorder %s36_s29, %s1209_s30  ;;  %p1215_p7 = scmp.lt.s32.totalorder %s1209_s30, %s1209_s30 }
  0x13   :  { %p1216_p8 = por %p1215_p7, %p1214_p6 }
  0x15   :  { %p1217_p9 = pnand %p1216_p8, %p1210_p5 }
  0x17   :  { %1220 = shalt.err (!%p1217_p9)
}
  0x18   :  { %41 = dma.hbm_to_vmem [thread:$0]  %s1492_s3, 256, %s36_s29, [#allocation6], %s1248_s24, %s1248_s24, %s1249_s25  }
  0x19   :  { %1241 = dma.done.wait [#allocation3], 256  }
  0x1a   :  { %1242 = vsyncadd [#allocation3], 4294967040 }
  0x1b   :  { %1243 = dma.done.wait [#allocation6], 256  }
  0x1c   :  { %1244 = vsyncadd [#allocation6], 4294967040  ;;  %v1314_v0 = vld [vmem:[%s1489_s0] sm:$0xff]  ;;  %vm88_vm0 = vcmask 261120   ;;  %v1319_v1 = vld [vmem:[%s1489_s0 + $0x8] sm:$0xff]  ;;  %v1251_v7 = vmov 0.0   ;;  %v55_v41 = vlaneseq }
  0x1d   :  { %v86_v2 = vmul.f32 %v1314_v0, %v1314_v0  ;;  %v87_v3 = vmul.f32 %v1319_v1, %v1319_v1  ;;  %v1119_v6 = vld [vmem:[#allocation2 + $0x8] sm:$0xff]   ;;  %1026 = vmatprep.subr.bf16.mxu1 %v1251_v7  ;;  %vm1252_vm1 = vmmov 0   ;;  %v1120_v8 = vld [vmem:[#allocation2] sm:$0xff]   ;;  %s1253_s12 = smov 16   ;;  %vm200_vm2 = vcmask 64512   ;;  %s1255_s15 = smov 120  }
  0x1e   :  { %1030 = vmatprep.mubr.msk.bf16.mxu1 %vm1252_vm1, %v1251_v7  ;;  %1027 = vmatpush3.bf16.msra.mxu1 %v1119_v6  ;;  %v165_v9 = vld [vmem:[%s1490_s1] sm:$0xff]  ;;  %v166_v10 = vld [vmem:[%s1490_s1 + $0x8] sm:$0xff]  ;;  %s1254_s1 = smov 96   ;;  %v56_v42 = vshrl.u32 %v55_v41, 7  ;;  %v65_v47 = vand.u32 127, %v55_v41  ;;  %vm259_vm15 = vcmask 130048  }
  0x1f   :  { %v89_v4 = vsel %vm88_vm0, %v86_v2, 0.0  ;;  %v92_v5 = vsel %vm88_vm0, %v87_v3, 0.0  ;;  %1028 = vmatprep.subr.bf16.mxu1 %v1251_v7  ;;  %171 = vrot.lane.b32.xlu1 %v165_v9, %s1253_s12  ;;  %v1256_v56 = vmov -1e+30   ;;  %s1257_s16 = smov 88   ;;  %s1258_s17 = smov 112  }
  0x20   :  { %90 = vadd.xlane.f32.xlu0 %v89_v4  ;;  %v58_v43 = vadd.s32 16, %v56_v42  ;;  %v60_v44 = vand.u32 15, %v56_v42  ;;  %v57_v45 = vadd.s32 8, %v56_v42  ;;  %v59_v48 = vadd.s32 24, %v56_v42  ;;  %s1259_s18 = smov 80   ;;  %s1260_s19 = smov 72  }
  0x22   :  { %1029 = vmatpush3.bf16.msra.mxu1 %v1120_v8  ;;  %v62_v46 = vand.u32 15, %v58_v43  ;;  %v70_v49 = vxor.u32 %v65_v47, %v60_v44  ;;  %v61_v50 = vand.u32 15, %v57_v45  ;;  %v63_v52 = vand.u32 15, %v59_v48 }
  0x23   :  { %173 = vrot.lane.b32.xlu1 %v166_v10, %s1253_s12  ;;  %vm66_vm3 = vcmp.ge.s32.totalorder %v60_v44, %v65_v47  ;;  %s1262_s12 = smov 32  }
  0x24   :  { %93 = vadd.xlane.f32.xlu0 %v92_v5  ;;  %v72_v51 = vxor.u32 %v65_v47, %v62_v46  ;;  %vm74_vm4 = vcmp.lt.s32.totalorder %v70_v49, 8  ;;  %v71_v53 = vxor.u32 %v65_v47, %v61_v50  ;;  %vm68_vm5 = vcmp.ge.s32.totalorder %v62_v46, %v65_v47 }
  0x25   :  { %v73_v54 = vxor.u32 %v65_v47, %v63_v52  ;;  %vm78_vm7 = vmand %vm66_vm3, %vm74_vm4  ;;  %vm67_vm8 = vcmp.ge.s32.totalorder %v61_v50, %v65_v47  ;;  %vm69_vm11 = vcmp.ge.s32.totalorder %v63_v52, %v65_v47  ;;  %vm370_vm3 = vcmask 1043456   ;;  %v191_v50 = vld [vmem:[#allocation5] sm:$0xf] }
  0x26   :  { %vm76_vm6 = vcmp.lt.s32.totalorder %v72_v51, 8  ;;  %vm75_vm9 = vcmp.lt.s32.totalorder %v71_v53, 8  ;;  %v1359_v57 = vsel %vm78_vm7, 0.0, %v1256_v56  ;;  %v419_v51 = vsel %vm370_vm3, %v191_v50, 0 }
  0x27   :  { %vm80_vm10 = vmand %vm68_vm5, %vm76_vm6  ;;  %vm77_vm12 = vcmp.lt.s32.totalorder %v73_v54, 8 }
  0x28   :  { %vm79_vm13 = vmand %vm67_vm8, %vm75_vm9  ;;  %v1361_v58 = vsel %vm80_vm10, 0.0, %v1256_v56 }
  0x29   :  { %vm81_vm14 = vmand %vm69_vm11, %vm77_vm12  ;;  %v1364_v62 = vsel %vm79_vm13, 0.0, %v1256_v56 }
  0x2a   :  { %v1368_v3 = vsel %vm81_vm14, 0.0, %v1256_v56 }
  0x91   :  { %v172_v22 = vpop.permute.xlu1 %171 }
  0x95   :  { %v174_v26 = vpop.permute.xlu1 %173 }
  0xa9   :  { %v91_v11 = vpop.xlane.xlu0 %90 }
  0xaa   :  { %v96_v12 = vmul.f32 0.03125, %v91_v11 }
  0xac   :  { %v98_v13 = vadd.f32 1e-06, %v96_v12 }
  0xad   :  { %v94_v14 = vpop.xlane.xlu0 %93 }
  0xae   :  { %v97_v15 = vmul.f32 0.03125, %v94_v14  ;;  %1133 = vrsqrt.f32 %v98_v13 }
  0xb0   :  { %v99_v16 = vadd.f32 1e-06, %v97_v15 }
  0xb2   :  { %1135 = vrsqrt.f32 %v99_v16 }
  0xbb   :  { %v1134_v17 = vpop.eup %1133 }
  0xbc   :  { %v102_v19 = vmul.f32 %v1134_v17, %v1314_v0 }
  0xbf   :  { %v1136_v18 = vpop.eup %1135 }
  0xc0   :  { %v103_v20 = vmul.f32 %v1136_v18, %v1319_v1 }
  0xc2   :  { %v104_v21 = vpack.c.bf16 %v103_v20, %v102_v19 }
  0xc4   :  { %1031 = vmatmul.mubr.msk.bf16.vlgmr.msra.gmra.mxu1 %vm88_vm0, %v104_v21 }
 0x184   :  { %v158_v23 = vpop.f32.mrf.mxu1 }
 0x185   :  { %v177_v24 = vmul.f32 %v172_v22, %v158_v23  ;;  %v167_v32 = vmul.f32 %v165_v9, %v158_v23 }
 0x186   :  { %v1032_v25 = vpop.f32.mrf.mxu1 }
 0x187   :  { %181 = vrot.lane.b32.xlu0 %v177_v24, %s1248_s24 }
 0x188   :  { %v161_v27 = vpop.f32.mrf.mxu1 }
 0x189   :  { %v1341_v28 = vpack.c.bf16 %v161_v27, %v158_v23  ;;  %v178_v29 = vmul.f32 %v174_v26, %v161_v27  ;;  %v168_v33 = vmul.f32 %v166_v10, %v161_v27 }
 0x18a   :  { %v1033_v30 = vpop.f32.mrf.mxu1 }
 0x18b   :  { %183 = vrot.lane.b32.xlu1 %v178_v29, %s1248_s24 }
 0x1f9   :  { %v182_v31 = vpop.permute.xlu0 %181 }
 0x1fa   :  { %v187_v35 = vadd.f32 %v182_v31, %v167_v32  ;;  %v192_v32 = vld [vmem:[#allocation5 + $0x4] sm:$0xf] }
 0x1fd   :  { %v184_v34 = vpop.permute.xlu1 %183 }
 0x1fe   :  { %v188_v36 = vadd.f32 %v184_v34, %v168_v33  ;;  %v372_v33 = vsel %vm370_vm3, %v192_v32, 0 }
 0x200   :  { %v1344_v37 = vpack.c.bf16 %v188_v36, %v187_v35 }
 0x202   :  { %198 = vrot.lane.b32.xlu1 %v1344_v37, %s1254_s1  ;;  %1036 = vmatprep.mubr.msk.bf16.mxu1 %vm200_vm2, %v1344_v37 }
 0x206   :  { %196 = vrot.lane.b32.xlu1 %v1344_v37, %s1255_s15 }
 0x274   :  { %v199_v38 = vpop.permute.xlu1 %198 }
 0x275   :  { %v208_v39 = vsel %vm200_vm2, %v199_v38, 0  ;;  %1098 = vmatprep.subr.msk.bf16.mxu1 %vm200_vm2, %v199_v38 }
 0x276   :  { %1035 = vmatpush3.bf16.xpose.msra.mxu1 %v208_v39 }
 0x277   :  { %1046 = vmatprep.subr.bf16.mxu1 %v1251_v7 }
 0x278   :  { %v1353_v40 = vpop.permute.xlu1 %196 }
 0x27d   :  { %1037 = vmatmul.mubr.msk.bf16.vlgmr.msra.gmra.mxu1 %vm200_vm2, %v1353_v40 }
 0x27e   :  { %1048 = vmatprep.mubr.msk.bf16.mxu1 %vm1252_vm1, %v1251_v7  ;;  %1047 = vmatpush3.bf16.msra.mxu1 %v372_v33 }
 0x33d   :  { %v1038_v55 = vpop.f32.mrf.mxu1 }
 0x33e   :  { %v253_v63 = vadd.f32 %v1038_v55, %v1361_v58 }
 0x33f   :  { %v244_v59 = vpop.f32.mrf.mxu1 }
 0x340   :  { %v245_v60 = vadd.f32 %v244_v59, %v1359_v57  ;;  %v266_v9 = vsel %vm259_vm15, %v253_v63, -inf }
 0x341   :  { %v1039_v61 = vpop.f32.mrf.mxu1 }
 0x342   :  { %v260_v2 = vsel %vm259_vm15, %v245_v60, -inf  ;;  %v256_v6 = vadd.f32 %v1039_v61, %v1368_v3 }
 0x343   :  { %v247_v4 = vpop.f32.mrf.mxu1  ;;  %261 = vmax.xlane.f32.xlu1 %v260_v2 }
 0x344   :  { %v248_v5 = vadd.f32 %v247_v4, %v1364_v62  ;;  %v269_v10 = vsel %vm259_vm15, %v256_v6, -inf }
 0x346   :  { %v263_v8 = vsel %vm259_vm15, %v248_v5, -inf }
 0x347   :  { %264 = vmax.xlane.f32.xlu0 %v263_v8  ;;  %267 = vmax.xlane.f32.xlu1 %v266_v9 }
 0x34b   :  { %270 = vmax.xlane.f32.xlu1 %v269_v10 }
 0x3cc   :  { %v262_v11 = vpop.xlane.xlu1 %261 }
 0x3cd   :  { %v272_v12 = vsub.f32 %v245_v60, %v262_v11 }
 0x3cf   :  { %v276_v19 = vmul.f32 1.442695, %v272_v12 }
 0x3d0   :  { %v265_v13 = vpop.xlane.xlu0 %264  ;;  %v268_v14 = vpop.xlane.xlu1 %267 }
 0x3d1   :  { %v273_v15 = vsub.f32 %v248_v5, %v265_v13  ;;  %v274_v16 = vsub.f32 %v253_v63, %v268_v14 }
 0x3d3   :  { %v278_v17 = vmul.f32 1.442695, %v273_v15  ;;  %v280_v18 = vmul.f32 1.442695, %v274_v16 }
 0x3d4   :  { %v271_v20 = vpop.xlane.xlu1 %270 }
 0x3d5   :  { %1137 = vpow2.f32 %v278_v17  ;;  %v275_v21 = vsub.f32 %v256_v6, %v271_v20 }
 0x3d6   :  { %1139 = vpow2.f32 %v280_v18 }
 0x3d7   :  { %v282_v22 = vmul.f32 1.442695, %v275_v21  ;;  %1141 = vpow2.f32 %v276_v19 }
 0x3d9   :  { %1143 = vpow2.f32 %v282_v22 }
 0x3e2   :  { %v1138_v23 = vpop.eup %1137 }
 0x3e3   :  { %v1140_v24 = vpop.eup %1139  ;;  %v287_v25 = vsel %vm259_vm15, %v1138_v23, 0.0 }
 0x3e4   :  { %288 = vadd.xlane.f32.xlu1 %v287_v25  ;;  %v290_v26 = vsel %vm259_vm15, %v1140_v24, 0.0  ;;  %v1142_v27 = vpop.eup %1141 }
 0x3e5   :  { %291 = vadd.xlane.f32.xlu0 %v290_v26  ;;  %v284_v31 = vsel %vm259_vm15, %v1142_v27, 0.0 }
 0x3e6   :  { %v1144_v29 = vpop.eup %1143 }
 0x3e7   :  { %v293_v30 = vsel %vm259_vm15, %v1144_v29, 0.0 }
 0x3e8   :  { %294 = vadd.xlane.f32.xlu1 %v293_v30 }
 0x3e9   :  { %285 = vadd.xlane.f32.xlu0 %v284_v31 }
 0x3f9   :  { %466 = vrot.lane.b32.xlu1 %v1344_v37, %s1257_s16 }
 0x3fd   :  { %462 = vrot.lane.b32.xlu1 %v1344_v37, %s1258_s17 }
 0x3ff   :  { %307 = vrot.lane.b32.xlu0 %v1341_v28, %s1259_s18 }
 0x403   :  { %464 = vrot.lane.b32.xlu0 %v1353_v40, %s1258_s17 }
 0x46d   :  { %v289_v34 = vpop.xlane.xlu1 %288 }
 0x46e   :  { %v292_v35 = vpop.xlane.xlu0 %291 }
 0x46f   :  { %1145 = vrcp.f32 %v292_v35 }
 0x470   :  { %1147 = vrcp.f32 %v289_v34 }
 0x471   :  { %v295_v36 = vpop.xlane.xlu1 %294 }
 0x472   :  { %v286_v38 = vpop.xlane.xlu0 %285  ;;  %1149 = vrcp.f32 %v295_v36 }
 0x473   :  { %1151 = vrcp.f32 %v286_v38 }
 0x475   :  { %v467_v39 = vpop.permute.xlu1 %466 }
 0x476   :  { %v308_v41 = vpop.permute.xlu0 %307  ;;  %1099 = vmatprep.subr.msk.bf16.mxu1 %vm200_vm2, %v467_v39  ;;  %v475_v59 = vsel %vm200_vm2, %v467_v39, 0 }
 0x477   :  { %1040 = vmatprep.subr.bf16.mxu0 %v308_v41 }
 0x478   :  { %1041 = vmatpush3.bf16.msra.mxu0 %v308_v41 }
 0x479   :  { %1052 = vmatprep.subr.bf16.mxu0 %v1251_v7  ;;  %v463_v60 = vpop.permute.xlu1 %462 }
 0x47a   :  { %v465_v63 = vpop.permute.xlu0 %464 }
 0x47c   :  { %v1146_v37 = vpop.eup %1145 }
 0x47d   :  { %v1148_v42 = vpop.eup %1147  ;;  %v301_v44 = vmul.f32 %v1146_v37, %v1140_v24 }
 0x47e   :  { %v299_v47 = vmul.f32 %v1148_v42, %v1138_v23 }
 0x47f   :  { %v1150_v43 = vpop.eup %1149 }
 0x480   :  { %v1152_v40 = vpop.eup %1151  ;;  %v303_v45 = vmul.f32 %v1150_v43, %v1144_v29 }
 0x481   :  { %v297_v46 = vmul.f32 %v1152_v40, %v1142_v27 }
 0x482   :  { %v305_v48 = vpack.c.bf16 %v303_v45, %v301_v44 }
 0x483   :  { %v304_v49 = vpack.c.bf16 %v299_v47, %v297_v46 }
 0x485   :  { %1042 = vmatprep.mubr.msk.bf16.mxu0 %vm259_vm15, %v304_v49 }
 0x486   :  { %1043 = vmatmul.mubr.msk.bf16.vlgmr.msra.gmra.mxu0 %vm259_vm15, %v305_v48 }
 0x487   :  { %1054 = vmatprep.mubr.msk.bf16.mxu0 %vm1252_vm1, %v1251_v7  ;;  %1053 = vmatpush3.bf16.msra.mxu0 %v419_v51 }
 0x546   :  { %v1044_v52 = vpop.f32.mrf.mxu0 }
 0x548   :  { %v350_v53 = vpop.f32.mrf.mxu0 }
 0x54a   :  { %v1045_v54 = vpop.f32.mrf.mxu0 }
 0x54b   :  { %v366_v55 = vpack.c.bf16 %v1045_v54, %v1044_v52 }
 0x54c   :  { %v353_v56 = vpop.f32.mrf.mxu0 }
 0x54d   :  { %v365_v61 = vpack.c.bf16 %v353_v56, %v350_v53  ;;  %1049 = vmatmul.mubr.msk.bf16.vlgmr.msra.gmra.mxu1 %vm200_vm2, %v366_v55 }
 0x54e   :  { %1059 = vmatpush3.bf16.xpose.msra.mxu1 %v475_v59  ;;  %1060 = vmatprep.mubr.msk.bf16.mxu1 %vm200_vm2, %v463_v60  ;;  %v193_v59 = vld [vmem:[#allocation5 + $0x8] sm:$0xf] }
 0x54f   :  { %1055 = vmatmul.mubr.msk.bf16.vlgmr.msra.gmra.mxu0 %vm200_vm2, %v365_v61  ;;  %1070 = vmatprep.subr.bf16.mxu1 %v1251_v7  ;;  %v635_v60 = vsel %vm370_vm3, %v193_v59, 0  ;;  %v194_v61 = vld [vmem:[#allocation5 + $0xc] sm:$0xf] }
 0x555   :  { %1061 = vmatmul.mubr.msk.bf16.vlgmr.msra.gmra.mxu1 %vm200_vm2, %v465_v63  ;;  %v685_v63 = vsel %vm370_vm3, %v194_v61, 0 }
 0x556   :  { %1072 = vmatprep.mubr.msk.bf16.mxu1 %vm1252_vm1, %v1251_v7  ;;  %1071 = vmatpush3.bf16.msra.mxu1 %v635_v60 }
 0x60d   :  { %v408_v2 = vpop.f32.mrf.mxu1 }
 0x60f   :  { %v1050_v4 = vpop.f32.mrf.mxu1  ;;  %v455_v5 = vpop.f32.mrf.mxu0 }
 0x610   :  { %v1399_v6 = vadd.f32 %v455_v5, %v408_v2 }
 0x611   :  { %v411_v8 = vpop.f32.mrf.mxu1  ;;  %v1056_v9 = vpop.f32.mrf.mxu0 }
 0x613   :  { %v1051_v10 = vpop.f32.mrf.mxu1  ;;  %v458_v11 = vpop.f32.mrf.mxu0 }
 0x614   :  { %v1401_v12 = vadd.f32 %v458_v11, %v411_v8 }
 0x615   :  { %v1057_v13 = vpop.f32.mrf.mxu0  ;;  %v1062_v14 = vpop.f32.mrf.mxu1 }
 0x616   :  { %v520_v22 = vadd.f32 %v1062_v14, %v1361_v58 }
 0x617   :  { %v511_v15 = vpop.f32.mrf.mxu1 }
 0x618   :  { %v512_v16 = vadd.f32 %v511_v15, %v1359_v57  ;;  %v532_v25 = vsel %vm259_vm15, %v520_v22, -inf }
 0x619   :  { %v1063_v17 = vpop.f32.mrf.mxu1 }
 0x61a   :  { %v523_v18 = vadd.f32 %v1063_v17, %v1368_v3  ;;  %v526_v19 = vsel %vm259_vm15, %v512_v16, -inf }
 0x61b   :  { %v514_v20 = vpop.f32.mrf.mxu1  ;;  %527 = vmax.xlane.f32.xlu1 %v526_v19 }
 0x61c   :  { %v515_v21 = vadd.f32 %v514_v20, %v1364_v62  ;;  %v535_v24 = vsel %vm259_vm15, %v523_v18, -inf }
 0x61e   :  { %v529_v23 = vsel %vm259_vm15, %v515_v21, -inf }
 0x61f   :  { %530 = vmax.xlane.f32.xlu0 %v529_v23  ;;  %536 = vmax.xlane.f32.xlu1 %v535_v24 }
 0x623   :  { %533 = vmax.xlane.f32.xlu0 %v532_v25 }
 0x6a4   :  { %v528_v57 = vpop.xlane.xlu1 %527 }
 0x6a5   :  { %v538_v30 = vsub.f32 %v512_v16, %v528_v57 }
 0x6a7   :  { %v542_v33 = vmul.f32 1.442695, %v538_v30 }
 0x6a8   :  { %v531_v26 = vpop.xlane.xlu0 %530  ;;  %v537_v3 = vpop.xlane.xlu1 %536 }
 0x6a9   :  { %v539_v27 = vsub.f32 %v515_v21, %v531_v26  ;;  %v541_v29 = vsub.f32 %v523_v18, %v537_v3 }
 0x6ab   :  { %v544_v31 = vmul.f32 1.442695, %v539_v27  ;;  %v548_v32 = vmul.f32 1.442695, %v541_v29  ;;  %v1261_v27 = vmov 0  }
 0x6ac   :  { %v534_v62 = vpop.xlane.xlu0 %533  ;;  %v1124_v29 = vld [vmem:[%s1493_s4] ss:$8 sps:$4 sm:$0xff]  }
 0x6ad   :  { %1153 = vpow2.f32 %v544_v31  ;;  %v540_v58 = vsub.f32 %v520_v22, %v534_v62 }
 0x6ae   :  { %1155 = vpow2.f32 %v548_v32 }
 0x6af   :  { %v546_v34 = vmul.f32 1.442695, %v540_v58 }
 0x6b1   :  { %1157 = vpow2.f32 %v546_v34 }
 0x6b2   :  { %1159 = vpow2.f32 %v542_v33 }
 0x6ba   :  { %v1154_v35 = vpop.eup %1153 }
 0x6bb   :  { %v553_v36 = vsel %vm259_vm15, %v1154_v35, 0.0  ;;  %v1156_v38 = vpop.eup %1155 }
 0x6bc   :  { %554 = vadd.xlane.f32.xlu1 %v553_v36  ;;  %v559_v37 = vsel %vm259_vm15, %v1156_v38, 0.0 }
 0x6be   :  { %v1158_v39 = vpop.eup %1157 }
 0x6bf   :  { %v556_v41 = vsel %vm259_vm15, %v1158_v39, 0.0  ;;  %v1160_v42 = vpop.eup %1159 }
 0x6c0   :  { %557 = vadd.xlane.f32.xlu0 %v556_v41  ;;  %560 = vadd.xlane.f32.xlu1 %v559_v37  ;;  %v550_v43 = vsel %vm259_vm15, %v1160_v42, 0.0  ;;  %v1127_v41 = vld [vmem:[%s1494_s5 + $0x28] sm:$0xff]   ;;  %v1128_v37 = vld [vmem:[%s1494_s5 + $0x20] sm:$0xff]  }
 0x6c4   :  { %551 = vadd.xlane.f32.xlu0 %v550_v43  ;;  %v1130_v43 = vld [vmem:[%s1494_s5 + $0x10] sm:$0xff]  }
 0x6da   :  { %572 = vrot.lane.b32.xlu0 %v1341_v28, %s1260_s19 }
 0x745   :  { %v555_v40 = vpop.xlane.xlu1 %554 }
 0x749   :  { %v558_v44 = vpop.xlane.xlu0 %557  ;;  %v561_v45 = vpop.xlane.xlu1 %560 }
 0x74a   :  { %1161 = vrcp.f32 %v558_v44  ;;  %v1132_v44 = vld [vmem:[%s1494_s5] sm:$0xff]  }
 0x74b   :  { %1163 = vrcp.f32 %v561_v45 }
 0x74c   :  { %1165 = vrcp.f32 %v555_v40  ;;  %v1131_v40 = vld [vmem:[%s1494_s5 + $0x8] sm:$0xff]  }
 0x74d   :  { %v552_v46 = vpop.xlane.xlu0 %551 }
 0x74e   :  { %1167 = vrcp.f32 %v552_v46 }
 0x751   :  { %v573_v47 = vpop.permute.xlu0 %572 }
 0x752   :  { %1064 = vmatprep.subr.bf16.mxu0 %v573_v47 }
 0x753   :  { %1065 = vmatpush3.bf16.msra.mxu0 %v573_v47 }
 0x754   :  { %1076 = vmatprep.subr.bf16.mxu0 %v1251_v7 }
 0x757   :  { %v1162_v48 = vpop.eup %1161 }
 0x758   :  { %v1164_v49 = vpop.eup %1163  ;;  %v567_v52 = vmul.f32 %v1162_v48, %v1158_v39 }
 0x759   :  { %v1166_v50 = vpop.eup %1165  ;;  %v569_v53 = vmul.f32 %v1164_v49, %v1156_v38 }
 0x75a   :  { %v565_v54 = vmul.f32 %v1166_v50, %v1154_v35 }
 0x75b   :  { %v1168_v51 = vpop.eup %1167  ;;  %v571_v56 = vpack.c.bf16 %v569_v53, %v567_v52 }
 0x75c   :  { %v563_v28 = vmul.f32 %v1168_v51, %v1160_v42  ;;  %v1129_v42 = vld [vmem:[%s1494_s5 + $0x18] sm:$0xff]   ;;  %s1263_s5 = smov [#allocation7]  }
 0x75d   :  { %s954_s13 = sshll.u32 %s1263_s5, 4  ;;  %s955_s13 = int_to_ptr.vmem [resolvable:$true] %s954_s13 }
 0x75e   :  { %v570_v55 = vpack.c.bf16 %v565_v54, %v563_v28  ;;  %s1221_s14 = scalar_lea.vmem %s955_s13, 256  ;;  %p1226_p11 = scmp.lt.s32.totalorder %s955_s13, %s955_s13 }
 0x75f   :  { %p1222_p10 = scmp.ne.s32.totalorder %s955_s13, %s1221_s14  ;;  %p1227_p12 = scmp.lt.s32.totalorder %s1221_s14, %s1221_s14 }
 0x760   :  { %1066 = vmatprep.mubr.msk.bf16.mxu0 %vm259_vm15, %v570_v55 }
 0x761   :  { %1067 = vmatmul.mubr.msk.bf16.vlgmr.msra.gmra.mxu0 %vm259_vm15, %v571_v56  ;;  %p1228_p13 = por %p1227_p12, %p1226_p11 }
 0x762   :  { %1078 = vmatprep.mubr.msk.bf16.mxu0 %vm1252_vm1, %v1251_v7  ;;  %1077 = vmatpush3.bf16.msra.mxu0 %v685_v63 }
 0x763   :  { %1082 = vmatprep.subr.bf16.mxu0 %v1251_v7  ;;  %p1229_p0 = pnand %p1228_p13, %p1222_p10 }
 0x821   :  { %v1068_v2 = vpop.f32.mrf.mxu0 }
 0x823   :  { %v615_v4 = vpop.f32.mrf.mxu0 }
 0x825   :  { %v1069_v5 = vpop.f32.mrf.mxu0 }
 0x826   :  { %v680_v8 = vpack.c.bf16 %v1069_v5, %v1068_v2 }
 0x827   :  { %v618_v9 = vpop.f32.mrf.mxu0 }
 0x828   :  { %v630_v10 = vpack.c.bf16 %v618_v9, %v615_v4  ;;  %1079 = vmatmul.mubr.msk.bf16.vlgmr.msra.gmra.mxu0 %vm200_vm2, %v680_v8 }
 0x829   :  { %1094 = vmatprep.mubr.msk.bf16.mxu0 %vm1252_vm1, %v1251_v7  ;;  %1083 = vmatpush3.bf16.msra.mxu0 %v1127_v41  ;;  %vm900_vm1 = vcmask 785408  }
 0x82a   :  { %1073 = vmatmul.mubr.msk.bf16.vlgmr.msra.gmra.mxu1 %vm200_vm2, %v630_v10  ;;  %1084 = vmatprep.subr.bf16.mxu0 %v1251_v7 }
 0x82b   :  { %808 = vmatprep.mubr.bf16.mxu1 %v1261_v27 }
 0x82d   :  { %1085 = vmatpush3.bf16.msra.mxu0 %v1128_v37 }
 0x82e   :  { %1086 = vmatprep.subr.bf16.mxu0 %v1251_v7 }
 0x831   :  { %1087 = vmatpush3.bf16.msra.mxu0 %v1129_v42 }
 0x832   :  { %1088 = vmatprep.subr.bf16.mxu0 %v1251_v7 }
 0x835   :  { %1089 = vmatpush3.bf16.msra.mxu0 %v1130_v43 }
 0x836   :  { %1090 = vmatprep.subr.bf16.mxu0 %v1251_v7 }
 0x839   :  { %1091 = vmatpush3.bf16.msra.mxu0 %v1131_v40 }
 0x83a   :  { %1092 = vmatprep.subr.bf16.mxu0 %v1251_v7 }
 0x83d   :  { %1093 = vmatpush3.bf16.msra.mxu0 %v1132_v44 }
 0x8e8   :  { %v721_v11 = vpop.f32.mrf.mxu0 }
 0x8ea   :  { %v671_v13 = vpop.f32.mrf.mxu1  ;;  %v1080_v14 = vpop.f32.mrf.mxu0 }
 0x8eb   :  { %v678_v15 = vadd.f32 %v671_v13, %v1399_v6 }
 0x8ec   :  { %v1074_v16 = vpop.f32.mrf.mxu1  ;;  %v724_v17 = vpop.f32.mrf.mxu0 }
 0x8ed   :  { %v728_v18 = vadd.f32 %v721_v11, %v678_v15 }
 0x8ee   :  { %v674_v19 = vpop.f32.mrf.mxu1  ;;  %v1081_v20 = vpop.f32.mrf.mxu0 }
 0x8ef   :  { %v1430_v21 = vadd.f32 %v728_v18, %v1314_v0  ;;  %v679_v22 = vadd.f32 %v674_v19, %v1401_v12  ;;  %v1121_v0 = vld [vmem:[%s1493_s4 + $0x10] ss:$8 sps:$4 sm:$0xff]   ;;  %v1123_v12 = vld [vmem:[%s1493_s4 + $0x14] ss:$8 sps:$4 sm:$0xff]  }
 0x8f0   :  { %v1075_v23 = vpop.f32.mrf.mxu1  ;;  %788 = vmatprep.subr.bf16.mxu1 %v1123_v12 }
 0x8f1   :  { %v729_v24 = vadd.f32 %v724_v17, %v679_v22  ;;  %v732_v25 = vmul.f32 %v1430_v21, %v1430_v21  ;;  %789 = vmatpush1.bf16.msra.mxu1 %v1121_v0 }
 0x8f3   :  { %v1436_v57 = vadd.f32 %v729_v24, %v1319_v1  ;;  %v734_v6 = vsel %vm88_vm0, %v732_v25, 0.0  ;;  %v1126_v1 = vld [vmem:[%s1493_s4 + $0x4] ss:$8 sps:$4 sm:$0xff]  }
 0x8f4   :  { %735 = vadd.xlane.f32.xlu1 %v734_v6  ;;  %790 = vmatprep.subr.bf16.mxu1 %v1126_v1 }
 0x8f5   :  { %v733_v26 = vmul.f32 %v1436_v57, %v1436_v57  ;;  %791 = vmatpush1.bf16.msra.mxu1 %v1124_v29 }
 0x8f7   :  { %v737_v3 = vsel %vm88_vm0, %v733_v26, 0.0 }
 0x8f8   :  { %738 = vadd.xlane.f32.xlu1 %v737_v3 }
 0x97d   :  { %v736_v30 = vpop.xlane.xlu1 %735 }
 0x97e   :  { %v740_v31 = vmul.f32 0.03125, %v736_v30 }
 0x980   :  { %v742_v32 = vadd.f32 1e-06, %v740_v31 }
 0x981   :  { %v739_v62 = vpop.xlane.xlu1 %738 }
 0x982   :  { %v741_v58 = vmul.f32 0.03125, %v739_v62  ;;  %1169 = vrsqrt.f32 %v742_v32 }
 0x984   :  { %v743_v33 = vadd.f32 1e-06, %v741_v58 }
 0x986   :  { %1171 = vrsqrt.f32 %v743_v33 }
 0x98f   :  { %v1170_v34 = vpop.eup %1169 }
 0x990   :  { %v746_v36 = vmul.f32 %v1170_v34, %v1430_v21 }
 0x993   :  { %v1172_v35 = vpop.eup %1171 }
 0x994   :  { %v747_v38 = vmul.f32 %v1172_v35, %v1436_v57 }
 0x996   :  { %v748_v39 = vpack.c.bf16 %v747_v38, %v746_v36 }
 0x998   :  { %986 = vmatmul.mubr.msk.bf16.vlgmr.msra.gmra.mxu1 %vm88_vm0, %v748_v39 }
 0xa58   :  { %v810_v45 = vpop.f32.mrf.mxu1 }
 0xa59   :  { %837 = vrot.lane.b32.xlu1 %v810_v45, %s1262_s12  ;;  %v987_v49 = vmul.f32 -1.442695, %v810_v45 }
 0xa5a   :  { %v812_v46 = vpop.f32.mrf.mxu1 }
 0xa5b   :  { %839 = vrot.lane.b32.xlu0 %v812_v46, %s1262_s12  ;;  %1173 = vpow2.f32 %v987_v49 }
 0xa5c   :  { %v814_v47 = vpop.f32.mrf.mxu1 }
 0xa5d   :  { %v988_v50 = vmul.f32 -1.442695, %v814_v47 }
 0xa5e   :  { %v816_v48 = vpop.f32.mrf.mxu1 }
 0xa5f   :  { %841 = vrot.lane.b32.xlu0 %v814_v47, %s1262_s12  ;;  %843 = vrot.lane.b32.xlu1 %v816_v48, %s1262_s12  ;;  %1175 = vpow2.f32 %v988_v50 }
 0xa68   :  { %v1174_v51 = vpop.eup %1173 }
 0xa69   :  { %v825_v52 = vadd.f32 1.0, %v1174_v51 }
 0xa6b   :  { %1177 = vrcp.f32 %v825_v52 }
 0xa6c   :  { %v1176_v7 = vpop.eup %1175 }
 0xa6d   :  { %v826_v53 = vadd.f32 1.0, %v1176_v7 }
 0xa6f   :  { %1179 = vrcp.f32 %v826_v53 }
 0xa78   :  { %v1178_v28 = vpop.eup %1177 }
 0xa79   :  { %v831_v60 = vmul.f32 %v1178_v28, %v810_v45 }
 0xa7c   :  { %v1180_v56 = vpop.eup %1179 }
 0xa7d   :  { %v832_v61 = vmul.f32 %v1180_v56, %v814_v47 }
 0xacb   :  { %v838_v54 = vpop.permute.xlu1 %837 }
 0xacd   :  { %v840_v55 = vpop.permute.xlu0 %839 }
 0xace   :  { %v845_v59 = vsel %vm88_vm0, %v838_v54, %v840_v55 }
 0xacf   :  { %v849_v5 = vmul.f32 %v845_v59, %v831_v60 }
 0xad1   :  { %v842_v63 = vpop.permute.xlu0 %841  ;;  %v844_v2 = vpop.permute.xlu1 %843 }
 0xad2   :  { %v846_v4 = vsel %vm88_vm0, %v842_v63, %v844_v2 }
 0xad3   :  { %v850_v8 = vmul.f32 %v846_v4, %v832_v61 }
 0xad5   :  { %v851_v9 = vpack.c.bf16 %v850_v8, %v849_v5 }
 0xad7   :  { %1095 = vmatmul.mubr.msk.bf16.vlgmr.msra.gmra.mxu0 %vm900_vm1, %v851_v9 }
 0xb97   :  { %v938_v10 = vpop.f32.mrf.mxu0 }
 0xb98   :  { %v945_v11 = vadd.f32 %v938_v10, %v1430_v21 }
 0xb99   :  { %v1096_v13 = vpop.f32.mrf.mxu0 }
 0xb9a   :  { %947 = vst.msk [vmem:[#allocation7] sm:$0xff] %vm88_vm0, %v945_v11 }
 0xb9b   :  { %v941_v14 = vpop.f32.mrf.mxu0 }
 0xb9c   :  { %v946_v15 = vadd.f32 %v941_v14, %v1436_v57 }
 0xb9d   :  { %v1097_v16 = vpop.f32.mrf.mxu0 }
 0xb9e   :  { %948 = vst.msk [vmem:[#allocation7 + $0x8] sm:$0xff] %vm88_vm0, %v946_v15 }
 0xb9f   :  { %1232 = shalt.err (!%p1229_p0)
}
 0xba0   :  { %s1264_s1 = smov 128   ;;  %s1265_s15 = smov 8  }
 0xba1   :  { %960 = dma.vmem_to_hbm [thread:$0]  %s955_s13, 256, %s1495_s6, [#allocation4], %s1264_s1, %s1264_s1, %s1265_s15  }
 0xba2   :  { %1245 = dma.done.wait [#allocation4], 256  }
 0xba3   :  { %1246 = vsyncadd [#allocation4], 4294967040 }
 0xba4   :  { %964 = vsyncpa [#allocation3], 1 }
 0xba5   :  { %965 = vsyncpa [#allocation6], 1 }
 0xba6   :  { %966 = vsyncpa [#allocation4], 1 }

</bundles_post_ra>
